<compile_context>
chip_gen: v7x
topology: tpu7x:2x2x1
jax: 0.10.0
libtpu: 0.0.40
codegen_flags: <defaults>
</compile_context>

<pallas_src>
import functools

import jax
import jax.numpy as jnp
from jax import lax
from jax.experimental import pallas as pl
from jax.experimental.pallas import tpu as pltpu


def _gpt2_attn_kernel(x_ref, bias_ref, wqkv_ref, bqkv_ref, wproj_ref,
                      bproj_ref, o_ref, acc_ref, *, scale):
    h = pl.program_id(1)
    n_heads = pl.num_programs(1)

    @pl.when(h == 0)
    def _():
        acc_ref[...] = jnp.zeros_like(acc_ref)

    # x block: (1, T, C) -> (T, C); cast once for bf16 MXU matmuls.
    x = x_ref[0].astype(jnp.bfloat16)

    # ---- c_attn, per-head slices (bf16 inputs, f32 accumulation) -----------
    q = jnp.dot(x, wqkv_ref[0, 0], preferred_element_type=jnp.float32) + bqkv_ref[0, 0]
    k = jnp.dot(x, wqkv_ref[1, 0], preferred_element_type=jnp.float32) + bqkv_ref[1, 0]
    v = jnp.dot(x, wqkv_ref[2, 0], preferred_element_type=jnp.float32) + bqkv_ref[2, 0]

    # ---- scaled dot-product scores (scale folded into q, no explicit k.T) --
    q16 = (q * scale).astype(jnp.bfloat16)            # (T, hs)
    k16 = k.astype(jnp.bfloat16)                      # (T, hs)
    s = lax.dot_general(q16, k16, (((1,), (1,)), ((), ())),
                        preferred_element_type=jnp.float32)   # (T, T)

    # additive causal bias: 0 on/below diagonal, -1e30 above (== masked_fill -inf)
    s = s + bias_ref[...]

    # ---- numerically-stable softmax over keys ------------------------------
    s = s - jnp.max(s, axis=-1, keepdims=True)
    p = jnp.exp(s)
    p = p * pl.reciprocal(jnp.sum(p, axis=-1, keepdims=True), approx=True)

    # ---- attention output for this head ------------------------------------
    attn = jnp.dot(p.astype(jnp.bfloat16), v.astype(jnp.bfloat16),
                   preferred_element_type=jnp.float32)         # (T, hs)

    # ---- fuse head-merge into c_proj: out += attn_h @ W_proj[h*hs:(h+1)*hs] -
    acc_ref[...] += jnp.dot(attn.astype(jnp.bfloat16), wproj_ref[0],
                            preferred_element_type=jnp.float32)  # (T, C)

    @pl.when(h == n_heads - 1)
    def _():
        o_ref[0] = (acc_ref[...] + bproj_ref[...]).astype(o_ref.dtype)


@functools.partial(jax.jit, static_argnames="n_heads")
def gpt2_attention(x, w_qkv, b_qkv, w_proj, b_proj, *, n_heads):
    """x: (B, T, C) f32.  w_qkv: (C, 3C), b_qkv: (1, 3C),
    w_proj: (C, C), b_proj: (1, C)  (Linear weights stored (in, out))."""
    B, T, C = x.shape
    assert C % n_heads == 0
    hs = C // n_heads
    scale = hs ** (-0.5)

    # Repack weights into head-sliced, lane-dense blocks; bf16 for the MXU.
    # (In production these repacks would be done once at load time.)
    w_qkv_r = w_qkv.reshape(C, 3, n_heads, hs).transpose(1, 2, 0, 3) \
                   .astype(jnp.bfloat16)                      # (3, H, C, hs)
    b_qkv_r = b_qkv.reshape(3, n_heads, 1, hs).astype(jnp.float32)  # (3, H, 1, hs)
    w_proj_r = w_proj.reshape(n_heads, hs, C).astype(jnp.bfloat16)  # (H, hs, C)
    b_proj_r = b_proj.reshape(1, C).astype(jnp.float32)             # (1, C)

    # Additive causal bias, computed once (0 where key <= query, else -1e30).
    row = lax.broadcasted_iota(jnp.int32, (T, T), 0)
    col = lax.broadcasted_iota(jnp.int32, (T, T), 1)
    mask_bias = jnp.where(col <= row, 0.0, -1e30).astype(jnp.float32)

    kernel = functools.partial(_gpt2_attn_kernel, scale=scale)

    return pl.pallas_call(
        kernel,
        out_shape=jax.ShapeDtypeStruct((B, T, C), x.dtype),
        grid_spec=pltpu.PrefetchScalarGridSpec(
            num_scalar_prefetch=0,
            grid=(B, n_heads),
            in_specs=[
                pl.BlockSpec((1, T, C), lambda b, h: (b, 0, 0)),         # x
                pl.BlockSpec((T, T), lambda b, h: (0, 0)),               # causal bias
                pl.BlockSpec((3, 1, C, hs), lambda b, h: (0, h, 0, 0)),  # W_qkv[head]
                pl.BlockSpec((3, 1, 1, hs), lambda b, h: (0, h, 0, 0)),  # b_qkv[head]
                pl.BlockSpec((1, hs, C), lambda b, h: (h, 0, 0)),        # W_proj[head]
                pl.BlockSpec((1, C), lambda b, h: (0, 0)),               # b_proj
            ],
            out_specs=pl.BlockSpec((1, T, C), lambda b, h: (b, 0, 0)),
            scratch_shapes=[pltpu.VMEM((T, C), jnp.float32)],            # c_proj acc
        ),
        compiler_params=pltpu.CompilerParams(
            dimension_semantics=("parallel", "arbitrary"),
            vmem_limit_bytes=48 * 1024 * 1024),
    )(x, mask_bias, w_qkv_r, b_qkv_r, w_proj_r, b_proj_r)


if __name__ == "__main__":
    # Small config consistent with the module: batch=2, seq=8, embed=32, heads=4.
    B, T, C, H = 2, 8, 32, 4

    key = jax.random.PRNGKey(0)
    kx, k1, k2, k3, k4 = jax.random.split(key, 5)

    # Deterministic synthetic parameters (Linear weights stored (in, out)).
    x = jax.random.normal(kx, (B, T, C), dtype=jnp.float32)
    w_qkv = jax.random.normal(k1, (C, 3 * C), dtype=jnp.float32) * 0.02
    b_qkv = jax.random.normal(k2, (1, 3 * C), dtype=jnp.float32) * 0.02
    w_proj = jax.random.normal(k3, (C, C), dtype=jnp.float32) * 0.02
    b_proj = jax.random.normal(k4, (1, C), dtype=jnp.float32) * 0.02

    out = gpt2_attention(x, w_qkv, b_qkv, w_proj, b_proj, n_heads=H)
    out = jax.block_until_ready(out)
    assert out.shape == (B, T, C) and out.dtype == jnp.float32
    print("KERNEL_OK")
</pallas_src>

<mosaic_0001>
module attributes {stable_mosaic.version = 11 : i64} {
  func.func @_gpt2_attn_kernel(%arg0: i32, %arg1: i32, %arg2: memref<1x8x32xf32, #tpu.memory_space<vmem>>, %arg3: memref<8x8xf32, #tpu.memory_space<vmem>>, %arg4: memref<3x1x32x8xbf16, #tpu.memory_space<vmem>>, %arg5: memref<3x1x1x8xf32, #tpu.memory_space<vmem>>, %arg6: memref<1x8x32xbf16, #tpu.memory_space<vmem>>, %arg7: memref<1x32xf32, #tpu.memory_space<vmem>>, %arg8: memref<1x8x32xf32, #tpu.memory_space<vmem>>, %arg9: memref<8x32xf32, #tpu.memory_space<vmem>>) attributes {dimension_semantics = [#tpu.dimension_semantics<parallel>, #tpu.dimension_semantics<arbitrary>], iteration_bounds = array<i64: 2, 4>, scalar_prefetch = 0 : i64, scratch_operands = 1 : i64, tpu.core_type = #tpu.core_type<tc>, window_params = [{transform_indices = @transform_0, window_bounds = array<i64: 1, 8, 32>}, {pipeline_mode = #tpu.pipeline_mode<synchronous>, transform_indices = @transform_1, window_bounds = array<i64: 8, 8>}, {transform_indices = @transform_2, window_bounds = array<i64: 3, 1, 32, 8>}, {transform_indices = @transform_3, window_bounds = array<i64: 3, 1, 1, 8>}, {transform_indices = @transform_4, window_bounds = array<i64: 1, 8, 32>}, {pipeline_mode = #tpu.pipeline_mode<synchronous>, transform_indices = @transform_5, window_bounds = array<i64: 1, 32>}, {transform_indices = @transform_6, window_bounds = array<i64: 1, 8, 32>}]} {
    %c0_i32 = arith.constant 0 : i32
    %0 = arith.cmpi eq, %arg1, %c0_i32 : i32
    %1 = arith.extui %0 : i1 to i32
    %c0_i32_0 = arith.constant 0 : i32
    %2 = arith.cmpi ne, %1, %c0_i32_0 : i32
    scf.if %2 {
      %cst_43 = arith.constant 0.000000e+00 : f32
      %57 = vector.broadcast %cst_43 : f32 to vector<8x32xf32>
      %c0_44 = arith.constant 0 : index
      %c0_45 = arith.constant 0 : index
      %58 = vector.load %arg9[%c0_44, %c0_45] : memref<8x32xf32, #tpu.memory_space<vmem>>, vector<8x32xf32>
      tpu.vector_store %arg9[%c0_44, %c0_45], %57 {strides = array<i32>} : memref<8x32xf32, #tpu.memory_space<vmem>>, vector<8x32xf32>,
    } else {
    }
    %c0 = arith.constant 0 : index
    %c0_1 = arith.constant 0 : index
    %c0_2 = arith.constant 0 : index
    %3 = vector.load %arg2[%c0, %c0_1, %c0_2] : memref<1x8x32xf32, #tpu.memory_space<vmem>>, vector<1x8x32xf32>
    %4 = vector.shape_cast %3 : vector<1x8x32xf32> to vector<8x32xf32>
    %5 = arith.truncf %4 : vector<8x32xf32> to vector<8x32xbf16>
    %c0_3 = arith.constant 0 : index
    %c0_4 = arith.constant 0 : index
    %c0_5 = arith.constant 0 : index
    %c0_6 = arith.constant 0 : index
    %6 = vector.load %arg4[%c0_3, %c0_4, %c0_5, %c0_6] : memref<3x1x32x8xbf16, #tpu.memory_space<vmem>>, vector<1x1x32x8xbf16>
    %7 = vector.shape_cast %6 : vector<1x1x32x8xbf16> to vector<32x8xbf16>
    %cst = arith.constant dense<0.000000e+00> : vector<8x8xf32>
    %8 = tpu.matmul %5, %7, %cst {dimension_numbers = #tpu.dot_dimension_numbers<[1], [0], [0], [1], [0, 0, 1, 1], [], []>} : vector<8x32xbf16>, vector<32x8xbf16>, vector<8x8xf32> -> vector<8x8xf32>
    %c0_7 = arith.constant 0 : index
    %c0_8 = arith.constant 0 : index
    %c0_9 = arith.constant 0 : index
    %c0_10 = arith.constant 0 : index
    %9 = vector.load %arg5[%c0_7, %c0_8, %c0_9, %c0_10] : memref<3x1x1x8xf32, #tpu.memory_space<vmem>>, vector<1x1x1x8xf32>
    %10 = vector.shape_cast %9 : vector<1x1x1x8xf32> to vector<1x8xf32>
    %11 = vector.broadcast %10 : vector<1x8xf32> to vector<8x8xf32>
    %12 = arith.addf %8, %11 : vector<8x8xf32>
    %c1 = arith.constant 1 : index
    %c0_11 = arith.constant 0 : index
    %c0_12 = arith.constant 0 : index
    %c0_13 = arith.constant 0 : index
    %13 = vector.load %arg4[%c1, %c0_11, %c0_12, %c0_13] : memref<3x1x32x8xbf16, #tpu.memory_space<vmem>>, vector<1x1x32x8xbf16>
    %14 = vector.shape_cast %13 : vector<1x1x32x8xbf16> to vector<32x8xbf16>
    %cst_14 = arith.constant dense<0.000000e+00> : vector<8x8xf32>
    %15 = tpu.matmul %5, %14, %cst_14 {dimension_numbers = #tpu.dot_dimension_numbers<[1], [0], [0], [1], [0, 0, 1, 1], [], []>} : vector<8x32xbf16>, vector<32x8xbf16>, vector<8x8xf32> -> vector<8x8xf32>
    %c1_15 = arith.constant 1 : index
    %c0_16 = arith.constant 0 : index
    %c0_17 = arith.constant 0 : index
    %c0_18 = arith.constant 0 : index
    %16 = vector.load %arg5[%c1_15, %c0_16, %c0_17, %c0_18] : memref<3x1x1x8xf32, #tpu.memory_space<vmem>>, vector<1x1x1x8xf32>
    %17 = vector.shape_cast %16 : vector<1x1x1x8xf32> to vector<1x8xf32>
    %18 = vector.broadcast %17 : vector<1x8xf32> to vector<8x8xf32>
    %19 = arith.addf %15, %18 : vector<8x8xf32>
    %c2 = arith.constant 2 : index
    %c0_19 = arith.constant 0 : index
    %c0_20 = arith.constant 0 : index
    %c0_21 = arith.constant 0 : index
    %20 = vector.load %arg4[%c2, %c0_19, %c0_20, %c0_21] : memref<3x1x32x8xbf16, #tpu.memory_space<vmem>>, vector<1x1x32x8xbf16>
    %21 = vector.shape_cast %20 : vector<1x1x32x8xbf16> to vector<32x8xbf16>
    %cst_22 = arith.constant dense<0.000000e+00> : vector<8x8xf32>
    %22 = tpu.matmul %5, %21, %cst_22 {dimension_numbers = #tpu.dot_dimension_numbers<[1], [0], [0], [1], [0, 0, 1, 1], [], []>} : vector<8x32xbf16>, vector<32x8xbf16>, vector<8x8xf32> -> vector<8x8xf32>
    %c2_23 = arith.constant 2 : index
    %c0_24 = arith.constant 0 : index
    %c0_25 = arith.constant 0 : index
    %c0_26 = arith.constant 0 : index
    %23 = vector.load %arg5[%c2_23, %c0_24, %c0_25, %c0_26] : memref<3x1x1x8xf32, #tpu.memory_space<vmem>>, vector<1x1x1x8xf32>
    %24 = vector.shape_cast %23 : vector<1x1x1x8xf32> to vector<1x8xf32>
    %25 = vector.broadcast %24 : vector<1x8xf32> to vector<8x8xf32>
    %26 = arith.addf %22, %25 : vector<8x8xf32>
    %cst_27 = arith.constant 0.353553385 : f32
    %27 = vector.broadcast %cst_27 : f32 to vector<8x8xf32>
    %28 = arith.mulf %12, %27 : vector<8x8xf32>
    %29 = arith.truncf %28 : vector<8x8xf32> to vector<8x8xbf16>
    %30 = arith.truncf %19 : vector<8x8xf32> to vector<8x8xbf16>
    %cst_28 = arith.constant dense<0.000000e+00> : vector<8x8xf32>
    %31 = tpu.matmul %29, %30, %cst_28 {dimension_numbers = #tpu.dot_dimension_numbers<[1], [1], [0], [0], [0, 0, 1, 0], [], []>} : vector<8x8xbf16>, vector<8x8xbf16>, vector<8x8xf32> -> vector<8x8xf32>
    %c0_29 = arith.constant 0 : index
    %c0_30 = arith.constant 0 : index
    %32 = vector.load %arg3[%c0_29, %c0_30] : memref<8x8xf32, #tpu.memory_space<vmem>>, vector<8x8xf32>
    %33 = arith.addf %31, %32 : vector<8x8xf32>
    %cst_31 = arith.constant dense<0xFF800000> : vector<8xf32>
    %34 = vector.multi_reduction <maximumf>, %33, %cst_31 [1] : vector<8x8xf32> to vector<8xf32>
    %35 = vector.shape_cast %34 : vector<8xf32> to vector<8x1xf32>
    %36 = vector.broadcast %35 : vector<8x1xf32> to vector<8x8xf32>
    %37 = arith.subf %33, %36 : vector<8x8xf32>
    %38 = math.exp %37 : vector<8x8xf32>
    %cst_32 = arith.constant dense<0.000000e+00> : vector<8xf32>
    %39 = vector.multi_reduction <add>, %38, %cst_32 [1] : vector<8x8xf32> to vector<8xf32>
    %40 = vector.shape_cast %39 : vector<8xf32> to vector<8x1xf32>
    %41 = tpu.reciprocal %40 {approx = true} : vector<8x1xf32> -> vector<8x1xf32>
    %42 = vector.broadcast %41 : vector<8x1xf32> to vector<8x8xf32>
    %43 = arith.mulf %38, %42 : vector<8x8xf32>
    %44 = arith.truncf %43 : vector<8x8xf32> to vector<8x8xbf16>
    %45 = arith.truncf %26 : vector<8x8xf32> to vector<8x8xbf16>
    %cst_33 = arith.constant dense<0.000000e+00> : vector<8x8xf32>
    %46 = tpu.matmul %44, %45, %cst_33 {dimension_numbers = #tpu.dot_dimension_numbers<[1], [0], [0], [1], [0, 0, 1, 1], [], []>} : vector<8x8xbf16>, vector<8x8xbf16>, vector<8x8xf32> -> vector<8x8xf32>
    %c0_34 = arith.constant 0 : index
    %c0_35 = arith.constant 0 : index
    %47 = vector.load %arg9[%c0_34, %c0_35] : memref<8x32xf32, #tpu.memory_space<vmem>>, vector<8x32xf32>
    %48 = arith.truncf %46 : vector<8x8xf32> to vector<8x8xbf16>
    %c0_36 = arith.constant 0 : index
    %c0_37 = arith.constant 0 : index
    %c0_38 = arith.constant 0 : index
    %49 = vector.load %arg6[%c0_36, %c0_37, %c0_38] : memref<1x8x32xbf16, #tpu.memory_space<vmem>>, vector<1x8x32xbf16>
    %50 = vector.shape_cast %49 : vector<1x8x32xbf16> to vector<8x32xbf16>
    %cst_39 = arith.constant dense<0.000000e+00> : vector<8x32xf32>
    %51 = tpu.matmul %48, %50, %cst_39 {dimension_numbers = #tpu.dot_dimension_numbers<[1], [0], [0], [1], [0, 0, 1, 1], [], []>} : vector<8x8xbf16>, vector<8x32xbf16>, vector<8x32xf32> -> vector<8x32xf32>
    %52 = arith.addf %47, %51 : vector<8x32xf32>
    %c0_40 = arith.constant 0 : index
    %c0_41 = arith.constant 0 : index
    %53 = vector.load %arg9[%c0_40, %c0_41] : memref<8x32xf32, #tpu.memory_space<vmem>>, vector<8x32xf32>
    tpu.vector_store %arg9[%c0_40, %c0_41], %52 {strides = array<i32>} : memref<8x32xf32, #tpu.memory_space<vmem>>, vector<8x32xf32>,
    %c3_i32 = arith.constant 3 : i32
    %54 = arith.cmpi eq, %arg1, %c3_i32 : i32
    %55 = arith.extui %54 : i1 to i32
    %c0_i32_42 = arith.constant 0 : i32
    %56 = arith.cmpi ne, %55, %c0_i32_42 : i32
    scf.if %56 {
      %c0_43 = arith.constant 0 : index
      %c0_44 = arith.constant 0 : index
      %57 = vector.load %arg9[%c0_43, %c0_44] : memref<8x32xf32, #tpu.memory_space<vmem>>, vector<8x32xf32>
      %c0_45 = arith.constant 0 : index
      %c0_46 = arith.constant 0 : index
      %58 = vector.load %arg7[%c0_45, %c0_46] : memref<1x32xf32, #tpu.memory_space<vmem>>, vector<1x32xf32>
      %59 = vector.broadcast %58 : vector<1x32xf32> to vector<8x32xf32>
      %60 = arith.addf %57, %59 : vector<8x32xf32>
      %c0_47 = arith.constant 0 : index
      %c0_48 = arith.constant 0 : index
      %c0_49 = arith.constant 0 : index
      %61 = vector.load %arg8[%c0_47, %c0_48, %c0_49] : memref<1x8x32xf32, #tpu.memory_space<vmem>>, vector<1x8x32xf32>
      %62 = vector.shape_cast %61 : vector<1x8x32xf32> to vector<8x32xf32>
      %63 = vector.shape_cast %60 : vector<8x32xf32> to vector<1x8x32xf32>
      tpu.vector_store %arg8[%c0_47, %c0_48, %c0_49], %63 {strides = array<i32>} : memref<1x8x32xf32, #tpu.memory_space<vmem>>, vector<1x8x32xf32>,
    } else {
    }
    return
  }
  func.func @transform_0(%arg0: i32, %arg1: i32) -> (i32, i32, i32) {
    %c0_i32 = arith.constant 0 : i32
    %c0_i32_0 = arith.constant 0 : i32
    %c0_i32_1 = arith.constant 0 : i32
    return %arg0, %c0_i32, %c0_i32_0 : i32, i32, i32
  }
  func.func @transform_1(%arg0: i32, %arg1: i32) -> (i32, i32) {
    %c0_i32 = arith.constant 0 : i32
    %c0_i32_0 = arith.constant 0 : i32
    %c0_i32_1 = arith.constant 0 : i32
    return %c0_i32, %c0_i32_0 : i32, i32
  }
  func.func @transform_2(%arg0: i32, %arg1: i32) -> (i32, i32, i32, i32) {
    %c0_i32 = arith.constant 0 : i32
    %c0_i32_0 = arith.constant 0 : i32
    %c0_i32_1 = arith.constant 0 : i32
    %c0_i32_2 = arith.constant 0 : i32
    return %c0_i32, %arg1, %c0_i32_0, %c0_i32_1 : i32, i32, i32, i32
  }
  func.func @transform_3(%arg0: i32, %arg1: i32) -> (i32, i32, i32, i32) {
    %c0_i32 = arith.constant 0 : i32
    %c0_i32_0 = arith.constant 0 : i32
    %c0_i32_1 = arith.constant 0 : i32
    %c0_i32_2 = arith.constant 0 : i32
    return %c0_i32, %arg1, %c0_i32_0, %c0_i32_1 : i32, i32, i32, i32
  }
  func.func @transform_4(%arg0: i32, %arg1: i32) -> (i32, i32, i32) {
    %c0_i32 = arith.constant 0 : i32
    %c0_i32_0 = arith.constant 0 : i32
    %c0_i32_1 = arith.constant 0 : i32
    return %arg1, %c0_i32, %c0_i32_0 : i32, i32, i32
  }
  func.func @transform_5(%arg0: i32, %arg1: i32) -> (i32, i32) {
    %c0_i32 = arith.constant 0 : i32
    %c0_i32_0 = arith.constant 0 : i32
    %c0_i32_1 = arith.constant 0 : i32
    return %c0_i32, %c0_i32_0 : i32, i32
  }
  func.func @transform_6(%arg0: i32, %arg1: i32) -> (i32, i32, i32) {
    %c0_i32 = arith.constant 0 : i32
    %c0_i32_0 = arith.constant 0 : i32
    %c0_i32_1 = arith.constant 0 : i32
    return %arg0, %c0_i32, %c0_i32_0 : i32, i32, i32
  }
}

</mosaic_0001>

<bundles_post_ra>
// kernel: gpt2_attention.1
= control target key start
LH: loop header
LB: loop body
LE: loop exit
PB: predicated region body
PF: predicated region fallthrough
CT: control target
= control target key end

     0   :  { %s1538_s0 = inlined_call_operand.vmem [shape: f32[2,8,32], index: 0, kind: input, shape index: {}]   ;;  %s1539_s1 = inlined_call_operand.vmem [shape: f32[8,8], index: 1, kind: input, shape index: {}]   ;;  %s1540_s2 = inlined_call_operand.vmem [shape: bf16[3,4,32,8], index: 2, kind: input, shape index: {}]   ;;  %s1541_s3 = inlined_call_operand.vmem [shape: f32[3,4,1,8], index: 3, kind: input, shape index: {}]   ;;  %s1542_s4 = inlined_call_operand.vmem [shape: bf16[4,8,32], index: 4, kind: input, shape index: {}]   ;;  %s1543_s5 = inlined_call_operand.vmem [shape: f32[1,32], index: 5, kind: input, shape index: {}]   ;;  %s1544_s6 = inlined_call_operand.hbm [shape: f32[2,8,32], index: 6, kind: output, shape index: {}]  }
   0x1   :  { %1550 = sst [smem:[#allocation13_spill]] %s1540_s2 }
   0x2   :  { %1551 = sst [smem:[#allocation14_spill]] %s1541_s3 }
   0x3   :  { %11 = vsyncpa [#allocation6], 0 }
   0x4   :  { %13 = vsyncpa [#allocation6 + $0x1], 0  ;;  %s1310_s21 = smov 0   ;;  %s1312_s22 = smov 0  }
   0x5   :  { %s1314_s23 = smov 0   ;;  %s1316_s24 = smov 0  }
   0x6   :  { %s1318_s25 = smov 0   ;;  %s1320_s26 = smov 0  }
   0x7   :  { %s1322_s27 = smov 0   ;;  %s1324_s28 = smov 0  }
   0x8   :  { %s1326_s29 = smov 0   ;;  %s1328_s30 = smov 0  }
   0x9 LB: > { %1552 = sst [smem:[#allocation8_spill]] %s1261_s28  ;;  %s955_s7 = sadd.s32 4294967295, %s1269_s30   ;;  %s1269_s30 = sphi %s1328_s30, %s19_s30   ;;  %s1265_s29 = sphi %s1326_s29, %s1567_s29   ;;  %s1261_s28 = sphi %s1324_s28, %s1566_s28   ;;  %s1257_s27 = sphi %s1322_s27, %s1565_s27   ;;  %s1253_s26 = sphi %s1320_s26, %s1564_s26   ;;  %s1249_s25 = sphi %s1318_s25, %s1572_s25   ;;  %s1245_s24 = sphi %s1316_s24, %s1571_s24   ;;  %s1241_s23 = sphi %s1314_s23, %s1570_s23   ;;  %s1237_s22 = sphi %s1312_s22, %s1569_s22   ;;  %s1233_s21 = sphi %s1310_s21, %s1568_s21  }
   0xa   : > { %1553 = sst [smem:[#allocation9_spill]] %s1265_s29  ;;  %s956_s8 = sadd.s32 4294967294, %s1269_s30  }
   0xb   : > { %s28_s9 = sadd.s32 1, %s1261_s28  ;;  %s31_s10 = sadd.s32 1, %s1265_s29 }
   0xc   : > { %p29_p0 = scmp.ge.s32.totalorder %s28_s9, 4  ;;  %s85_s11 = sadd.s32 1, %s1249_s25 }
   0xd   : > { %p92_p1 = scmp.ne.s32.totalorder %s1249_s25, %s1245_s24  ;;  %p93_p2 = scmp.eq.s32.totalorder %s1269_s30, 0 }
   0xe   : > { %s1574_s9 = smov (%p29_p0, %s28_s9), 0  ;;  %s1576_s10 = smov (!%p29_p0, %s31_s10), %s1265_s29 }
   0xf   : > { %1554 = sst [smem:[#allocation10_spill]] %s1574_s9  ;;  %s82_s12 = ssub.s32 %s1261_s28, %s1574_s9 }
  0x10   : > { %p1373_p3 = por %p93_p2, %p92_p1  ;;  %p33_p4 = scmp.ge.s32.totalorder %s1576_s10, 2 }
  0x11   : > { %p83_p5 = scmp.eq.s32.totalorder %s82_s12, 0  ;;  %s184_s14 = sadd.s32 1, %s1241_s23 }
  0x12   : > { %p194_p6 = scmp.ne.s32.totalorder %s1241_s23, %s1237_s22  ;;  %s1578_s10 = smov (%p33_p4, %s1576_s10), 0 }
  0x13   : > { %1556 = sst [smem:[#allocation11_spill]] %s1578_s10  ;;  %s181_s16 = ssub.s32 %s1265_s29, %s1578_s10 }
  0x14   : > { %s1383_s15 = scalar_select %p83_p5, %s1249_s25, %s85_s11  }
  0x15   : > { %p195_p7 = scmp.eq.s32.totalorder %s955_s7, 7  ;;  %p182_p8 = scmp.eq.s32.totalorder %s181_s16, 0 }
  0x16   : > { %1557 = sst [smem:[#allocation12_spill]] %s1383_s15  ;;  %p200_p9 = scmp.ne.s32.totalorder %s1237_s22, %s1233_s21 }
  0x17   : > { %p1389_p10 = por %p195_p7, %p194_p6  ;;  %p201_p11 = scmp.eq.s32.totalorder %s956_s8, 7 }
  0x18   : > { %s1394_s18 = scalar_select %p182_p8, %s1241_s23, %s184_s14  }
  0x19   : > { %p1396_p12 = por %p201_p11, %p200_p9  ;;  %p958_p13 = scmp.ge.s32.totalorder %s1269_s30, 8 }
  0x1b   : > { %223 = sbr.rel (%p958_p13) target bundleno = 58 (0x3a), region = 24 }
  0x22   : > { %233 = sbr.rel (!%p1373_p3) target bundleno = 47 (0x2f), region = 32  ;;  %s235_s20 = sand.u32 (%p1373_p3), 1, %s1249_s25  }
  0x23   : > { %s997_s7 = sshll.u32 (%p1373_p3), %s1261_s28, 4  ;;  %s1055_s11 = smul.u32 (%p1373_p3), 48, %s235_s20 }
  0x24   : > { %s1560_s2 = sld [smem:[#allocation13_spill]] (%p1373_p3) }
  0x25   : > { %s237_s14 = scalar_lea.vmem (%p1373_p3), [#allocation3], %s1055_s11 }
  0x2a   : > { %s240_s8 = scalar_lea.vmem %s1560_s2, %s997_s7 }
  0x2b   : > { %v256_v0 = vld [vmem:[%s240_s8] sm:$0xff]   ;;  %v260_v1 = vld [vmem:[%s240_s8 + $0x8] sm:$0xff]  }
  0x2c   : > { %v264_v2 = vld [vmem:[%s240_s8 + $0x40] sm:$0xff]   ;;  %v268_v3 = vld [vmem:[%s240_s8 + $0x48] sm:$0xff]   ;;  %257 = vst [vmem:[%s237_s14] sm:$0xff] %v256_v0   ;;  %261 = vst [vmem:[%s237_s14 + $0x8] sm:$0xff] %v260_v1  }
  0x2d   : > { %v272_v4 = vld [vmem:[%s240_s8 + $0x80] sm:$0xff]   ;;  %v276_v5 = vld [vmem:[%s240_s8 + $0x88] sm:$0xff]   ;;  %265 = vst [vmem:[%s237_s14 + $0x10] sm:$0xff] %v264_v2   ;;  %269 = vst [vmem:[%s237_s14 + $0x18] sm:$0xff] %v268_v3  }
  0x2e   : > { %273 = vst [vmem:[%s237_s14 + $0x20] sm:$0xff] %v272_v4   ;;  %277 = vst [vmem:[%s237_s14 + $0x28] sm:$0xff] %v276_v5  }
  0x2f PF: > { %326 = sbr.rel (!%p1373_p3) target bundleno = 58 (0x3a), region = 73  ;;  %s328_s20 = sand.u32 (%p1373_p3), 1, %s1249_s25  }
  0x30   : > { %s1561_s3 = sld [smem:[#allocation14_spill]] (%p1373_p3)  ;;  %s1056_s2 = smul.u32 (%p1373_p3), 3, %s328_s20 }
  0x32   : > { %s330_s11 = scalar_lea.vmem (%p1373_p3), [#allocation4], %s1056_s2 }
  0x36   : > { %s331_s16 = scalar_lea.vmem %s1561_s3, %s1261_s28 }
  0x37   : > { %v347_v6 = vld [vmem:[%s331_s16] sm:$0x1]  ;;  %v349_v7 = vld [vmem:[%s331_s16 + $0x4] sm:$0x1]  ;;  %v351_v8 = vld [vmem:[%s331_s16 + $0x8] sm:$0x1] }
  0x38   : > { %348 = vst [vmem:[%s330_s11] sm:$0x1] %v347_v6  ;;  %350 = vst [vmem:[%s330_s11 + $0x1] sm:$0x1] %v349_v7 }
  0x39   : > { %352 = vst [vmem:[%s330_s11 + $0x2] sm:$0x1] %v351_v8 }
  0x3a PF: > { %p961_p0 = scmp.ge.s32.totalorder %s1269_s30, 1  ;;  %p379_p1 = scmp.lt.s32.totalorder %s1269_s30, 9 }
  0x3c   : > { %p380_p2 = pnand %p961_p0, %p379_p1 }
  0x3d   : > { %s386_s13 = sand.u32 (!%p380_p2), 1, %s1245_s24   ;;  %s1549_s2 = sand.u32 (!%p380_p2), 1, %s1237_s22  }
  0x3e   : > { %383 = sbr.rel (%p380_p2) target bundleno = 1305 (0x519), region = 111  ;;  %s1421_s14 = sshll.u32 (!%p380_p2), %s1549_s2, 3 }
  0x3f   : > { %s1057_s8 = smul.u32 (!%p380_p2), 48, %s386_s13  ;;  %p434_p3 = scmp.lt.s32.totalorder (!%p380_p2), %s1257_s27, 1 }
  0x40   : > { %s1058_s20 = smul.u32 (!%p380_p2), 3, %s386_s13  ;;  %p438_p4 = scmp.lt.s32.totalorder (!%p380_p2), %s1253_s26, 3 }
  0x41   : > { %s1435_s15 = scalar_lea.vmem (!%p380_p2), [#allocation3], %s1057_s8  ;;  %s433_s13 = scalar_lea.vmem (!%p380_p2), [#allocation5], %s1421_s14 }
  0x42   : > { %s1437_s2 = scalar_lea.vmem (!%p380_p2), [#allocation4], %s1058_s20  ;;  %p965_p5 = scmp.ne.s32.totalorder (!%p380_p2), %s1253_s26, 0 }
  0x45   : > { %s435_s7 = scalar_select %p434_p3, %s1257_s27, 1 }
  0x46   : > { %s439_s12 = scalar_select %p438_p4, %s1253_s26, 3 }
  0x47   : > { %s963_s16 = sshll.u32 %s435_s7, 3  ;;  %446 = sbr.rel (%p965_p5) target bundleno = 78 (0x4e), region = 123  ;;  %vm447_vm0 = vcmask (!%p965_p5), 261120   ;;  %v1271_v9 = vmov (!%p965_p5), 0.0  }
  0x48   : > { %s437_s10 = scalar_lea.vmem %s1538_s0, %s963_s16  ;;  %s964_s9 = sshll.u32 %s439_s12, 2  ;;  %448 = vst.msk [vmem:[#allocation2] sm:$0xff] (!%p965_p5), %vm447_vm0, %v1271_v9 }
  0x49   : > { %s1433_s24 = scalar_lea.vmem %s1542_s4, %s964_s9 }
  0x4e PF: > { %v1149_v10 = vld [vmem:[%s1435_s15 + $0x10] sm:$0xff]   ;;  %v1272_v11 = vmov 0.0   ;;  %v1150_v12 = vld [vmem:[%s1435_s15] sm:$0xff]   ;;  %v1151_v13 = vld [vmem:[%s1435_s15 + $0x18] sm:$0xff]   ;;  %vm1273_vm1 = vmmov 0   ;;  %vm474_vm2 = vcmask 261120  }
  0x4f   : > { %1021 = vmatprep.subr.bf16.mxu1 %v1272_v11  ;;  %1013 = vmatprep.subr.bf16.mxu0 %v1272_v11  ;;  %v449_v14 = vld [vmem:[%s437_s10] sm:$0xff]  ;;  %v975_v17 = vld [vmem:[%s1437_s2 + $0x1] ss:$0 sm:$0xff]  ;;  %v966_v18 = vld [vmem:[%s1437_s2] ss:$0 sm:$0xff]  ;;  %vm652_vm3 = vcmask 64512  }
  0x50   : > { %1022 = vmatpush3.bf16.msra.mxu1 %v1149_v10  ;;  %1025 = vmatprep.mubr.msk.bf16.mxu1 %vm1273_vm1, %v1272_v11  ;;  %v1152_v15 = vld [vmem:[%s1435_s15 + $0x8] sm:$0xff]   ;;  %v450_v16 = vpack.c.bf16 %v449_v14, %v449_v14  ;;  %v1153_v33 = vld [vmem:[%s1435_s15 + $0x20] sm:$0xff]   ;;  %vm715_vm4 = vcmask 1043456   ;;  %p991_p6 = scmp.ne.s32.totalorder %s1253_s26, 3 }
  0x51   : > { %1023 = vmatprep.subr.bf16.mxu1 %v1272_v11  ;;  %1014 = vmatpush3.bf16.msra.mxu0 %v1150_v12  ;;  %v1154_v34 = vld [vmem:[%s1435_s15 + $0x28] sm:$0xff]   ;;  %v984_v50 = vld [vmem:[%s1437_s2 + $0x2] ss:$0 sm:$0xff] }
  0x52   : > { %1015 = vmatprep.subr.bf16.mxu0 %v1272_v11  ;;  %1017 = vmatprep.mubr.msk.bf16.mxu0 %vm1273_vm1, %v1272_v11  ;;  %v651_v35 = vld [vmem:[%s1539_s1] sm:$0xff] }
  0x53   : > { %v761_v55 = vld [vmem:[%s1433_s24] sm:$0xf] }
  0x54   : > { %1024 = vmatpush3.bf16.msra.mxu1 %v1151_v13  ;;  %v766_v56 = vsel %vm715_vm4, %v761_v55, 0  ;;  %v759_v2 = vld [vmem:[#allocation2] sm:$0xff] }
  0x55   : > { %1016 = vmatpush3.bf16.msra.mxu0 %v1152_v15  ;;  %1037 = vmatprep.subr.bf16.mxu1 %v1272_v11  ;;  %v992_v9 = vld [vmem:[%s1543_s5] ss:$0 sm:$0xff] (!%p991_p6) }
  0x56   : > { %1029 = vmatprep.subr.bf16.mxu0 %v1272_v11 }
  0x57   : > { %1026 = vmatmul.mubr.msk.bf16.vlgmr.msra.gmra.mrb[0].mxu1 %vm474_vm2, %v450_v16 }
  0x58   : > { %1018 = vmatmul.mubr.msk.bf16.vlgmr.msra.gmra.mrb[0].mxu0 %vm474_vm2, %v450_v16  ;;  %1039 = vmatprep.mubr.msk.bf16.mxu1 %vm1273_vm1, %v1272_v11 }
  0x59   : > { %1033 = vmatprep.mubr.msk.bf16.mxu0 %vm1273_vm1, %v1272_v11  ;;  %1030 = vmatpush3.bf16.msra.mxu0 %v1153_v33 }
  0x5a   : > { %1031 = vmatprep.subr.bf16.mxu0 %v1272_v11 }
  0x5d   : > { %1032 = vmatpush3.bf16.msra.mxu0 %v1154_v34 }
  0x5e   : > { %1043 = vmatprep.subr.bf16.mxu0 %v1272_v11 }
  0x60   : > { %1034 = vmatmul.mubr.msk.bf16.vlgmr.msra.gmra.mrb[4].mxu0 %vm474_vm2, %v450_v16 }
  0x61   : > { %1045 = vmatprep.mubr.msk.bf16.mxu0 %vm1273_vm1, %v1272_v11 }
 0x12a   : > { %v577_v19 = vpop.f32.mrb[0].mxu1 }
 0x12b   : > { %v578_v20 = vadd.f32 %v975_v17, %v577_v19  ;;  %v1027_v21 = vpop.f32.mrb[1].mxu1  ;;  %v512_v22 = vpop.f32.mrb[0].mxu0 }
 0x12c   : > { %v580_v23 = vpop.f32.mrb[2].mxu1  ;;  %v513_v24 = vadd.f32 %v966_v18, %v512_v22  ;;  %v1019_v25 = vpop.f32.mrb[1].mxu0 }
 0x12d   : > { %v650_v26 = vpack.c.bf16 %v578_v20, %v578_v20  ;;  %v1028_v27 = vpop.f32.mrb[3].mxu1  ;;  %v515_v28 = vpop.f32.mrb[2].mxu0 }
 0x12e   : > { %v1020_v29 = vpop.f32.mrb[3].mxu0  ;;  %v648_v31 = vmul.f32 0.35355338, %v513_v24 }
 0x12f   : > { %v657_v30 = vsel %vm652_vm3, %v650_v26, 0 }
 0x130   : > { %1038 = vmatpush3.bf16.xpose.msra.mxu1 %v657_v30  ;;  %v649_v32 = vpack.c.bf16 %v648_v31, %v648_v31 }
 0x131   : > { %1049 = vmatprep.subr.bf16.mxu1 %v1272_v11 }
 0x133   : > { %v642_v47 = vpop.f32.mrb[4].mxu0 }
 0x134   : > { %v1035_v48 = vpop.f32.mrb[5].mxu0  ;;  %v643_v52 = vadd.f32 %v984_v50, %v642_v47 }
 0x135   : > { %v645_v49 = vpop.f32.mrb[6].mxu0 }
 0x136   : > { %v1036_v51 = vpop.f32.mrb[7].mxu0  ;;  %v711_v53 = vpack.c.bf16 %v643_v52, %v643_v52 }
 0x137   : > { %1040 = vmatmul.mubr.msk.bf16.vlgmr.msra.gmra.mrb[4].mxu1 %vm652_vm3, %v649_v32 }
 0x138   : > { %1051 = vmatprep.mubr.msk.bf16.mxu1 %vm1273_vm1, %v1272_v11  ;;  %v717_v54 = vsel %vm715_vm4, %v711_v53, 0  ;;  %1050 = vmatpush3.bf16.msra.mxu1 %v766_v56 }
 0x139   : > { %1044 = vmatpush3.bf16.msra.mxu0 %v717_v54 }
 0x20a   : > { %v693_v36 = vpop.f32.mrb[4].mxu1 }
 0x20b   : > { %v694_v37 = vadd.f32 %v693_v36, %v651_v35  ;;  %v1041_v38 = vpop.f32.mrb[5].mxu1 }
 0x20c   : > { %v696_v39 = vpop.f32.mrb[6].mxu1 }
 0x20d   : > { %v1042_v40 = vpop.f32.mrb[7].mxu1  ;;  %v699_v41 = vsel %vm652_vm3, %v694_v37, -inf }
 0x20e   : > { %700 = vmax.xlane.f32.xlu0 %v699_v41 }
 0x29b   : > { %v701_v42 = vpop.xlane.xlu0 %700 }
 0x29c   : > { %v702_v43 = vsub.f32 %v694_v37, %v701_v42 }
 0x29e   : > { %v703_v44 = vmul.f32 1.442695, %v702_v43 }
 0x2a0   : > { %1155 = vpow2.f32 %v703_v44 }
 0x2aa   : > { %v1156_v45 = vpop.eup %1155 }
 0x2ab   : > { %v705_v46 = vsel %vm652_vm3, %v1156_v45, 0.0 }
 0x2ac   : > { %706 = vadd.xlane.f32.xlu0 %v705_v46 }
 0x339   : > { %v707_v57 = vpop.xlane.xlu0 %706 }
 0x33a   : > { %1157 = vrcp.f32 %v707_v57 }
 0x344   : > { %v1158_v58 = vpop.eup %1157 }
 0x345   : > { %v709_v59 = vmul.f32 %v1158_v58, %v1156_v45 }
 0x347   : > { %v710_v60 = vpack.c.bf16 %v709_v59, %v709_v59 }
 0x349   : > { %1046 = vmatmul.mubr.msk.bf16.vlgmr.msra.gmra.mrb[8].mxu0 %vm652_vm3, %v710_v60 }
 0x41c   : > { %v753_v61 = vpop.f32.mrb[8].mxu0 }
 0x41d   : > { %v760_v62 = vpack.c.bf16 %v753_v61, %v753_v61  ;;  %v1047_v63 = vpop.f32.mrb[9].mxu0 }
 0x41e   : > { %v756_v0 = vpop.f32.mrb[10].mxu0 }
 0x41f   : > { %v1048_v1 = vpop.f32.mrb[11].mxu0  ;;  %1052 = vmatmul.mubr.msk.bf16.vlgmr.msra.gmra.mrb[8].mxu1 %vm652_vm3, %v760_v62 }
 0x4ef   : > { %813 = sbr.rel (%p991_p6) target bundleno = 1280 (0x500), region = 127 }
 0x4f2   : > { %v802_v3 = vpop.f32.mrb[8].mxu1 }
 0x4f3   : > { %v808_v4 = vadd.f32 %v802_v3, %v759_v2  ;;  %v1053_v5 = vpop.f32.mrb[9].mxu1 }
 0x4f4   : > { %v805_v6 = vpop.f32.mrb[10].mxu1 }
 0x4f5   : > { %809 = vst.msk [vmem:[#allocation2] sm:$0xff] %vm474_vm2, %v808_v4  ;;  %v1054_v7 = vpop.f32.mrb[11].mxu1 }
 0x4fc   : > { %v814_v8 = vld [vmem:[#allocation2] sm:$0xff] }
 0x4fd   : > { %v822_v10 = vadd.f32 %v992_v9, %v814_v8 }
 0x4ff   : > { %823 = vst.msk [vmem:[%s433_s13] sm:$0xff] %vm474_vm2, %v822_v10 }
 0x500 PF: > { %s994_s10 = sshll.u32 %s1257_s27, 7  ;;  %s838_s8 = sshll.u32 %s433_s13, 4  ;;  %s839_s8 = int_to_ptr.vmem [resolvable:$true] %s838_s8 }
 0x501   : > { %s1481_s26 = scalar_lea.hbm %s1544_s6, %s994_s10  ;;  %s1562_s20 = sand.u32 1, %s1237_s22  }
 0x502   : > { %s825_s7 = scalar_lea.sflag [#allocation6], %s1562_s20  ;;  %s1159_s12 = scalar_lea.vmem %s839_s8, 128 }
 0x503   : > { %p1160_p7 = scmp.ne.s32.totalorder %s839_s8, %s1159_s12  ;;  %s1274_s16 = smov [#allocation5]  }
 0x504   : > { %s1163_s11 = sshll.u32 %s1274_s16, 4  ;;  %s1164_s11 = int_to_ptr.vmem [resolvable:$false] %s1163_s11 }
 0x505   : > { %p1161_p8 = pnand %p1160_p7, %p1389_p10  ;;  %s1165_s24 = scalar_lea.vmem %s1164_s11, 256 }
 0x506   : > { %p1166_p11 = scmp.lt.s32.totalorder %s839_s8, %s1164_s11  ;;  %p1167_p13 = scmp.lt.s32.totalorder %s1165_s24, %s1159_s12 }
 0x507   : > { %p1162_p9 = pneg %p1161_p8 }
 0x508   : > { %p1168_p0 = por %p1167_p13, %p1166_p11 }
 0x50a   : > { %p1169_p1 = pnand %p1168_p0, %p1162_p9 }
 0x50c   : > { %1172 = shalt.err (!%p1169_p1)
}
 0x50d   : > { %s1173_s27 = scalar_lea.hbm %s1481_s26, 128  ;;  %s1177_s3 = scalar_lea.hbm %s1544_s6, 256 }
 0x50e   : > { %p1174_p2 = scmp.ne.s32.totalorder %s1481_s26, %s1173_s27  ;;  %p1178_p5 = scmp.lt.u32.totalorder %s1481_s26, %s1544_s6 }
 0x50f   : > { %p1179_p6 = scmp.lt.u32.totalorder %s1177_s3, %s1173_s27  ;;  %p1181_p8 = scmp.lt.u32.totalorder %s1173_s27, %s1481_s26 }
 0x510   : > { %p1175_p3 = pnand %p1174_p2, %p1389_p10 }
 0x511   : > { %p1180_p7 = por %p1179_p6, %p1178_p5 }
 0x512   : > { %p1176_p4 = pneg %p1175_p3 }
 0x513   : > { %p1182_p9 = por %p1181_p8, %p1180_p7 }
 0x515   : > { %p1183_p11 = pnand %p1182_p9, %p1176_p4 }
 0x517   : > { %1186 = shalt.err (!%p1183_p11)
}
 0x518   : > { %1059 = dma.vmem_to_hbm [thread:$0]  (%p1389_p10), %s839_s8, 128, %s1481_s26, %s825_s7  }
 0x519 PF: > { %p1065_p13 = scmp.ge.s32.totalorder %s1269_s30, 2  ;;  %s850_s9 = sand.u32 1, %s1233_s21  }
 0x51a   : > { %s851_s10 = scalar_lea.sflag [#allocation6], %s850_s9 }
 0x51b   : > { %p1062_p0 = pnand %p1065_p13, %p1396_p12 }
 0x51d   : > { %1228 = dma.done.wait (!%p1062_p0), %s851_s10, 128  }
 0x51e   : > { %1230 = vsyncadd (!%p1062_p0), %s851_s10, 4294967168  ;;  %s19_s30 = sadd.s32 1, %s1269_s30   ;;  %s1563_s17 = sld [smem:[#allocation12_spill]] }
 0x51f   : > { %p16_p1 = scmp.ge.s32.totalorder %s19_s30, 10   ;;  %s1564_s26 = sld [smem:[#allocation8_spill]] }
 0x520   : > { %s1565_s27 = sld [smem:[#allocation9_spill]]  ;;  %s1566_s28 = sld [smem:[#allocation10_spill]] }
 0x521   : > { %s1567_s29 = sld [smem:[#allocation11_spill]]  ;;  %s1568_s21 = smov %s1237_s22 }
 0x522   : > { %s1569_s22 = smov %s1241_s23  ;;  %s1570_s23 = smov %s1394_s18 }
 0x523   : > { %s1571_s24 = smov %s1249_s25  ;;  %18 = sbr.rel (!%p16_p1) target bundleno = 9 (0x9), region = 185 }
 0x524   : > { %s1572_s25 = smov %s1563_s17 }
 0x52a   :  { %856 = vsyncpa [#allocation6], 1 }
 0x52b   :  { %858 = vsyncpa [#allocation6 + $0x1], 1 }

</bundles_post_ra>
